<compile_context>
chip_gen: v5e
topology: v5e:2x2
jax: 0.10.0
libtpu: 0.0.40
codegen_flags: <defaults>
</compile_context>

<pallas_src>
import functools

import jax
import jax.numpy as jnp
from jax.experimental import pallas as pl
from jax.experimental.pallas import tpu as pltpu


def _kl_loss_kernel(t_ref, s_ref, o_ref, m_t, z_t, a_t, m_s, z_s, *,
                    inv_t, n_rows, n_cols, mask_rows, mask_lanes):
    i = pl.program_id(0)            # batch-tile index
    j = pl.program_id(1)            # class-chunk index
    tb, tc = t_ref.shape

    inv_T = jnp.float32(inv_t)
    NEG = jnp.float32(-3.0e38)      # finite "-inf" used only as a max identity

    # Fresh per-row online-softmax state at the first class chunk of a tile.
    @pl.when(j == 0)
    def _():
        m_t[...] = jnp.full_like(m_t, NEG)
        m_s[...] = jnp.full_like(m_s, NEG)
        z_t[...] = jnp.zeros_like(z_t)
        z_s[...] = jnp.zeros_like(z_s)
        a_t[...] = jnp.zeros_like(a_t)

    t = t_ref[...].astype(jnp.float32)        # (tb, tc) raw teacher logits
    s = s_ref[...].astype(jnp.float32)        # (tb, tc) raw student logits

    row_valid = None
    if mask_rows:
        row_ids = i * tb + jax.lax.broadcasted_iota(jnp.int32, (tb, 1), 0)
        row_valid = row_ids < n_rows
        # Out-of-range rows: teacher == student == 0  =>  exactly zero KL.
        t = jnp.where(row_valid, t, 0.0)
        s = jnp.where(row_valid, s, 0.0)

    if mask_lanes:
        col_ids = j * tc + jax.lax.broadcasted_iota(jnp.int32, (tb, tc), 1)
        lane_valid = col_ids < n_cols
        t_for_max = jnp.where(lane_valid, t, NEG)
        s_for_max = jnp.where(lane_valid, s, NEG)
    else:
        t_for_max, s_for_max = t, s

    # ---- teacher: online max / sum-exp / weighted logit-diff ----
    m_t_old = m_t[...]
    m_t_new = jnp.maximum(m_t_old, jnp.max(t_for_max, axis=1, keepdims=True))
    alpha_t = jnp.exp(jnp.maximum((m_t_old - m_t_new) * inv_T, -100.0))
    e_t = jnp.exp((t - m_t_new) * inv_T)                    # (tb, tc)
    d = (t - s) * inv_T                                     # (tb, tc)
    if mask_lanes:
        z_c = jnp.where(lane_valid, e_t, 0.0)
        a_c = jnp.where(lane_valid, e_t * d, 0.0)
    else:
        z_c = e_t
        a_c = e_t * d
    z_t[...] = alpha_t * z_t[...] + jnp.sum(z_c, axis=1, keepdims=True)
    a_t[...] = alpha_t * a_t[...] + jnp.sum(a_c, axis=1, keepdims=True)
    m_t[...] = m_t_new

    # ---- student: online log-sum-exp ----
    m_s_old = m_s[...]
    m_s_new = jnp.maximum(m_s_old, jnp.max(s_for_max, axis=1, keepdims=True))
    alpha_s = jnp.exp(jnp.maximum((m_s_old - m_s_new) * inv_T, -100.0))
    e_s = jnp.exp((s - m_s_new) * inv_T)
    if mask_lanes:
        e_s = jnp.where(lane_valid, e_s, 0.0)
    z_s[...] = alpha_s * z_s[...] + jnp.sum(e_s, axis=1, keepdims=True)
    m_s[...] = m_s_new

    # ---- finalize this batch tile on the last class chunk ----
    @pl.when(j == pl.num_programs(1) - 1)
    def _():
        zt = z_t[...]
        zs = z_s[...]
        # per-row KL: A/Zt - (m_t - m_s)/T - log Zt + log Zs
        row_kl = (a_t[...] / zt
                  - (m_t[...] - m_s[...]) * inv_T
                  - jnp.log(zt) + jnp.log(zs))
        if mask_rows:
            row_kl = jnp.where(row_valid, row_kl, 0.0)
        partial = jnp.sum(row_kl)
        # Lane-dense, aligned (1, 8, 128) output block: scalar at [0, 0, 0],
        # zeros elsewhere -> one unmasked full-vreg store per batch tile.
        sub_idx = jax.lax.broadcasted_iota(jnp.int32, o_ref.shape, 1)
        lane_idx = jax.lax.broadcasted_iota(jnp.int32, o_ref.shape, 2)
        o_ref[...] = jnp.where((sub_idx == 0) & (lane_idx == 0), partial,
                               jnp.float32(0.0))


def kl_loss_pallas(teacher_pred, student_pred, T=3,
                   max_block_b=1024, max_block_c=None):
    """teacher_pred, student_pred: (B, C) logits (same dtype). Scalar f32 loss."""
    assert teacher_pred.shape == student_pred.shape
    assert teacher_pred.dtype == student_pred.dtype
    B, C = teacher_pred.shape
    itemsize = jnp.dtype(teacher_pred.dtype).itemsize
    sub = {4: 8, 2: 16, 1: 32}.get(itemsize, 8)     # sublane packing multiple

    # Generation-aware VMEM budget (v5e/v6e: 128 MiB, v7x: 64 MiB per core).
    try:
        cap = int(getattr(pltpu.get_tpu_info(), "vmem_capacity_bytes", 0)) or 0
    except Exception:
        cap = 0
    if cap <= 0:
        cap = 64 * 1024 * 1024                      # conservative v7x default
    budget = int(cap * 0.55)                        # tiles + f32 temporaries
    vmem_limit = int(cap * 0.85)

    # Bytes resident per (row, class) element:
    #   2 inputs x 2 pipeline buffers x itemsize   (BlockSpec double buffering)
    # + ~6 tile-sized f32 temporaries forced by the reductions.
    per_elem = 2 * 2 * itemsize + 6 * 4

    def _rup(x, m):
        return ((x + m - 1) // m) * m

    def _row_tile(limit):
        limit = max(1, limit)
        if limit >= B or B <= sub:
            return B                                # full-height block
        return max(sub, (min(limit, B) // sub) * sub)

    tb_fit = budget // (per_elem * C)
    if (max_block_c is None or max_block_c >= C) and tb_fit >= sub:
        # Full-width class blocks: single reduction pass, no lane masking.
        tc = C
        tb = _row_tile(min(max_block_b, tb_fit))
    else:
        # Vocab-scale C (or forced): chunk the class axis (online softmax).
        tb = _row_tile(min(max_block_b, 256))
        tc_fit = budget // (per_elem * max(tb, 1))
        tc = max(128, (tc_fit // 128) * 128)
        tc = min(tc, _rup(C, 128))
        if max_block_c is not None:
            tc = min(tc, max(128, (max_block_c // 128) * 128))
        if tc >= C:
            tc = C

    nbt = pl.cdiv(B, tb)
    nct = pl.cdiv(C, tc)
    mask_rows = (nbt * tb != B)
    mask_lanes = (nct * tc != C)

    kernel = functools.partial(
        _kl_loss_kernel, inv_t=1.0 / float(T), n_rows=B, n_cols=C,
        mask_rows=mask_rows, mask_lanes=mask_lanes)

    partials = pl.pallas_call(
        kernel,
        out_shape=jax.ShapeDtypeStruct((nbt, 8, 128), jnp.float32),
        grid_spec=pltpu.PrefetchScalarGridSpec(
            num_scalar_prefetch=0,
            grid=(nbt, nct),
            in_specs=[
                pl.BlockSpec((tb, tc), lambda i, j: (i, j)),
                pl.BlockSpec((tb, tc), lambda i, j: (i, j)),
            ],
            out_specs=pl.BlockSpec((1, 8, 128), lambda i, j: (i, 0, 0)),
            scratch_shapes=[pltpu.VMEM((tb, 1), jnp.float32)] * 5,
        ),
        compiler_params=pltpu.CompilerParams(
            dimension_semantics=("parallel", "arbitrary"),
            vmem_limit_bytes=vmem_limit,
        ),
    )(teacher_pred, student_pred)

    # Final reduction + T^2 / B scaling in the wrapper (divide by the REAL B).
    return (float(T) ** 2) * jnp.sum(partials) / jnp.float32(B)


def kl_loss_ref(teacher_pred, student_pred, T=3):
    s_log = jax.nn.log_softmax(student_pred / T, axis=1)
    t_log = jax.nn.log_softmax(teacher_pred / T, axis=1)
    t = jnp.exp(t_log)
    return (T ** 2) * jnp.sum(t * (t_log - s_log)) / teacher_pred.shape[0]


if __name__ == "__main__":
    key = jax.random.PRNGKey(0)
    k1, k2, k3, k4, k5, k6 = jax.random.split(key, 6)

    # Case 1: small (batch=8, classes=32) f32 logits, single tile.
    B, C = 8, 32
    teacher = jax.random.normal(k1, (B, C), jnp.float32) * 2.0
    student = jax.random.normal(k2, (B, C), jnp.float32) * 2.0
    loss = jax.block_until_ready(kl_loss_pallas(teacher, student, T=3))
    ref = kl_loss_ref(teacher, student, T=3)
    assert jnp.allclose(loss, ref, rtol=1e-5, atol=1e-5), (loss, ref)

    # Case 2: multi-tile batch grid with a batch remainder (the previously
    # failing configuration) — now handled by in-kernel row masking, no pad.
    B2, C2 = 72, 160
    teacher2 = jax.random.normal(k3, (B2, C2), jnp.float32) * 2.0
    student2 = jax.random.normal(k4, (B2, C2), jnp.float32) * 2.0
    loss2 = jax.block_until_ready(
        kl_loss_pallas(teacher2, student2, T=3, max_block_b=16))
    ref2 = kl_loss_ref(teacher2, student2, T=3)
    assert jnp.allclose(loss2, ref2, rtol=1e-5, atol=1e-5), (loss2, ref2)

    # Case 3: bf16 inputs + forced class-axis chunking (online-softmax path)
    # with both batch and class remainders.
    B3, C3 = 24, 300
    teacher3 = (jax.random.normal(k5, (B3, C3), jnp.float32) * 2.0
                ).astype(jnp.bfloat16)
    student3 = (jax.random.normal(k6, (B3, C3), jnp.float32) * 2.0
                ).astype(jnp.bfloat16)
    loss3 = jax.block_until_ready(
        kl_loss_pallas(teacher3, student3, T=3,
                       max_block_b=16, max_block_c=128))
    ref3 = kl_loss_ref(teacher3.astype(jnp.float32),
                       student3.astype(jnp.float32), T=3)
    assert jnp.allclose(loss3, ref3, rtol=1e-3, atol=1e-3), (loss3, ref3)

    print("KERNEL_OK")
</pallas_src>

<mosaic_0001>
module attributes {stable_mosaic.version = 11 : i64} {
  func.func @_kl_loss_kernel(%arg0: i32, %arg1: i32, %arg2: memref<8x32xf32, #tpu.memory_space<vmem>>, %arg3: memref<8x32xf32, #tpu.memory_space<vmem>>, %arg4: memref<1x8x128xf32, #tpu.memory_space<vmem>>, %arg5: memref<8x1xf32, #tpu.memory_space<vmem>>, %arg6: memref<8x1xf32, #tpu.memory_space<vmem>>, %arg7: memref<8x1xf32, #tpu.memory_space<vmem>>, %arg8: memref<8x1xf32, #tpu.memory_space<vmem>>, %arg9: memref<8x1xf32, #tpu.memory_space<vmem>>) attributes {dimension_semantics = [#tpu.dimension_semantics<parallel>, #tpu.dimension_semantics<arbitrary>], iteration_bounds = array<i64: 1, 1>, scalar_prefetch = 0 : i64, scratch_operands = 5 : i64, tpu.core_type = #tpu.core_type<tc>, window_params = [{transform_indices = @transform_0, window_bounds = array<i64: 8, 32>}, {transform_indices = @transform_1, window_bounds = array<i64: 8, 32>}, {transform_indices = @transform_2, window_bounds = array<i64: 1, 8, 128>}]} {
    %c0_i32 = arith.constant 0 : i32
    %0 = arith.cmpi eq, %arg1, %c0_i32 : i32
    %1 = arith.extui %0 : i1 to i32
    %cst = arith.constant -3.000000e+38 : f32
    %c0_i32_0 = arith.constant 0 : i32
    %2 = arith.cmpi ne, %1, %c0_i32_0 : i32
    scf.if %2 {
      %62 = vector.broadcast %cst : f32 to vector<8x1xf32>
      %c0_39 = arith.constant 0 : index
      %c0_40 = arith.constant 0 : index
      %63 = vector.load %arg5[%c0_39, %c0_40] : memref<8x1xf32, #tpu.memory_space<vmem>>, vector<8x1xf32>
      tpu.vector_store %arg5[%c0_39, %c0_40], %62 {strides = array<i32>} : memref<8x1xf32, #tpu.memory_space<vmem>>, vector<8x1xf32>,
      %64 = vector.broadcast %cst : f32 to vector<8x1xf32>
      %c0_41 = arith.constant 0 : index
      %c0_42 = arith.constant 0 : index
      %65 = vector.load %arg8[%c0_41, %c0_42] : memref<8x1xf32, #tpu.memory_space<vmem>>, vector<8x1xf32>
      tpu.vector_store %arg8[%c0_41, %c0_42], %64 {strides = array<i32>} : memref<8x1xf32, #tpu.memory_space<vmem>>, vector<8x1xf32>,
      %cst_43 = arith.constant 0.000000e+00 : f32
      %66 = vector.broadcast %cst_43 : f32 to vector<8x1xf32>
      %c0_44 = arith.constant 0 : index
      %c0_45 = arith.constant 0 : index
      %67 = vector.load %arg6[%c0_44, %c0_45] : memref<8x1xf32, #tpu.memory_space<vmem>>, vector<8x1xf32>
      tpu.vector_store %arg6[%c0_44, %c0_45], %66 {strides = array<i32>} : memref<8x1xf32, #tpu.memory_space<vmem>>, vector<8x1xf32>,
      %cst_46 = arith.constant 0.000000e+00 : f32
      %68 = vector.broadcast %cst_46 : f32 to vector<8x1xf32>
      %c0_47 = arith.constant 0 : index
      %c0_48 = arith.constant 0 : index
      %69 = vector.load %arg9[%c0_47, %c0_48] : memref<8x1xf32, #tpu.memory_space<vmem>>, vector<8x1xf32>
      tpu.vector_store %arg9[%c0_47, %c0_48], %68 {strides = array<i32>} : memref<8x1xf32, #tpu.memory_space<vmem>>, vector<8x1xf32>,
      %cst_49 = arith.constant 0.000000e+00 : f32
      %70 = vector.broadcast %cst_49 : f32 to vector<8x1xf32>
      %c0_50 = arith.constant 0 : index
      %c0_51 = arith.constant 0 : index
      %71 = vector.load %arg7[%c0_50, %c0_51] : memref<8x1xf32, #tpu.memory_space<vmem>>, vector<8x1xf32>
      tpu.vector_store %arg7[%c0_50, %c0_51], %70 {strides = array<i32>} : memref<8x1xf32, #tpu.memory_space<vmem>>, vector<8x1xf32>,
    } else {
    }
    %c0 = arith.constant 0 : index
    %c0_1 = arith.constant 0 : index
    %3 = vector.load %arg2[%c0, %c0_1] : memref<8x32xf32, #tpu.memory_space<vmem>>, vector<8x32xf32>
    %c0_2 = arith.constant 0 : index
    %c0_3 = arith.constant 0 : index
    %4 = vector.load %arg3[%c0_2, %c0_3] : memref<8x32xf32, #tpu.memory_space<vmem>>, vector<8x32xf32>
    %c0_4 = arith.constant 0 : index
    %c0_5 = arith.constant 0 : index
    %5 = vector.load %arg5[%c0_4, %c0_5] : memref<8x1xf32, #tpu.memory_space<vmem>>, vector<8x1xf32>
    %cst_6 = arith.constant dense<0xFF800000> : vector<8xf32>
    %6 = vector.multi_reduction <maximumf>, %3, %cst_6 [1] : vector<8x32xf32> to vector<8xf32>
    %7 = vector.shape_cast %6 : vector<8xf32> to vector<8x1xf32>
    %8 = arith.maximumf %5, %7 : vector<8x1xf32>
    %9 = arith.subf %5, %8 : vector<8x1xf32>
    %cst_7 = arith.constant 0.333333343 : f32
    %10 = vector.broadcast %cst_7 : f32 to vector<8x1xf32>
    %11 = arith.mulf %9, %10 : vector<8x1xf32>
    %cst_8 = arith.constant -1.000000e+02 : f32
    %12 = vector.broadcast %cst_8 : f32 to vector<8x1xf32>
    %13 = arith.maximumf %11, %12 : vector<8x1xf32>
    %14 = math.exp %13 : vector<8x1xf32>
    %15 = vector.broadcast %8 : vector<8x1xf32> to vector<8x32xf32>
    %16 = arith.subf %3, %15 : vector<8x32xf32>
    %cst_9 = arith.constant 0.333333343 : f32
    %17 = vector.broadcast %cst_9 : f32 to vector<8x32xf32>
    %18 = arith.mulf %16, %17 : vector<8x32xf32>
    %19 = math.exp %18 : vector<8x32xf32>
    %20 = arith.subf %3, %4 : vector<8x32xf32>
    %cst_10 = arith.constant 0.333333343 : f32
    %21 = vector.broadcast %cst_10 : f32 to vector<8x32xf32>
    %22 = arith.mulf %20, %21 : vector<8x32xf32>
    %23 = arith.mulf %19, %22 : vector<8x32xf32>
    %c0_11 = arith.constant 0 : index
    %c0_12 = arith.constant 0 : index
    %24 = vector.load %arg6[%c0_11, %c0_12] : memref<8x1xf32, #tpu.memory_space<vmem>>, vector<8x1xf32>
    %25 = arith.mulf %14, %24 : vector<8x1xf32>
    %cst_13 = arith.constant dense<0.000000e+00> : vector<8xf32>
    %26 = vector.multi_reduction <add>, %19, %cst_13 [1] : vector<8x32xf32> to vector<8xf32>
    %27 = vector.shape_cast %26 : vector<8xf32> to vector<8x1xf32>
    %28 = arith.addf %25, %27 : vector<8x1xf32>
    %c0_14 = arith.constant 0 : index
    %c0_15 = arith.constant 0 : index
    %29 = vector.load %arg6[%c0_14, %c0_15] : memref<8x1xf32, #tpu.memory_space<vmem>>, vector<8x1xf32>
    tpu.vector_store %arg6[%c0_14, %c0_15], %28 {strides = array<i32>} : memref<8x1xf32, #tpu.memory_space<vmem>>, vector<8x1xf32>,
    %c0_16 = arith.constant 0 : index
    %c0_17 = arith.constant 0 : index
    %30 = vector.load %arg7[%c0_16, %c0_17] : memref<8x1xf32, #tpu.memory_space<vmem>>, vector<8x1xf32>
    %31 = arith.mulf %14, %30 : vector<8x1xf32>
    %cst_18 = arith.constant dense<0.000000e+00> : vector<8xf32>
    %32 = vector.multi_reduction <add>, %23, %cst_18 [1] : vector<8x32xf32> to vector<8xf32>
    %33 = vector.shape_cast %32 : vector<8xf32> to vector<8x1xf32>
    %34 = arith.addf %31, %33 : vector<8x1xf32>
    %c0_19 = arith.constant 0 : index
    %c0_20 = arith.constant 0 : index
    %35 = vector.load %arg7[%c0_19, %c0_20] : memref<8x1xf32, #tpu.memory_space<vmem>>, vector<8x1xf32>
    tpu.vector_store %arg7[%c0_19, %c0_20], %34 {strides = array<i32>} : memref<8x1xf32, #tpu.memory_space<vmem>>, vector<8x1xf32>,
    %c0_21 = arith.constant 0 : index
    %c0_22 = arith.constant 0 : index
    %36 = vector.load %arg5[%c0_21, %c0_22] : memref<8x1xf32, #tpu.memory_space<vmem>>, vector<8x1xf32>
    tpu.vector_store %arg5[%c0_21, %c0_22], %8 {strides = array<i32>} : memref<8x1xf32, #tpu.memory_space<vmem>>, vector<8x1xf32>,
    %c0_23 = arith.constant 0 : index
    %c0_24 = arith.constant 0 : index
    %37 = vector.load %arg8[%c0_23, %c0_24] : memref<8x1xf32, #tpu.memory_space<vmem>>, vector<8x1xf32>
    %cst_25 = arith.constant dense<0xFF800000> : vector<8xf32>
    %38 = vector.multi_reduction <maximumf>, %4, %cst_25 [1] : vector<8x32xf32> to vector<8xf32>
    %39 = vector.shape_cast %38 : vector<8xf32> to vector<8x1xf32>
    %40 = arith.maximumf %37, %39 : vector<8x1xf32>
    %41 = arith.subf %37, %40 : vector<8x1xf32>
    %cst_26 = arith.constant 0.333333343 : f32
    %42 = vector.broadcast %cst_26 : f32 to vector<8x1xf32>
    %43 = arith.mulf %41, %42 : vector<8x1xf32>
    %cst_27 = arith.constant -1.000000e+02 : f32
    %44 = vector.broadcast %cst_27 : f32 to vector<8x1xf32>
    %45 = arith.maximumf %43, %44 : vector<8x1xf32>
    %46 = math.exp %45 : vector<8x1xf32>
    %47 = vector.broadcast %40 : vector<8x1xf32> to vector<8x32xf32>
    %48 = arith.subf %4, %47 : vector<8x32xf32>
    %cst_28 = arith.constant 0.333333343 : f32
    %49 = vector.broadcast %cst_28 : f32 to vector<8x32xf32>
    %50 = arith.mulf %48, %49 : vector<8x32xf32>
    %51 = math.exp %50 : vector<8x32xf32>
    %c0_29 = arith.constant 0 : index
    %c0_30 = arith.constant 0 : index
    %52 = vector.load %arg9[%c0_29, %c0_30] : memref<8x1xf32, #tpu.memory_space<vmem>>, vector<8x1xf32>
    %53 = arith.mulf %46, %52 : vector<8x1xf32>
    %cst_31 = arith.constant dense<0.000000e+00> : vector<8xf32>
    %54 = vector.multi_reduction <add>, %51, %cst_31 [1] : vector<8x32xf32> to vector<8xf32>
    %55 = vector.shape_cast %54 : vector<8xf32> to vector<8x1xf32>
    %56 = arith.addf %53, %55 : vector<8x1xf32>
    %c0_32 = arith.constant 0 : index
    %c0_33 = arith.constant 0 : index
    %57 = vector.load %arg9[%c0_32, %c0_33] : memref<8x1xf32, #tpu.memory_space<vmem>>, vector<8x1xf32>
    tpu.vector_store %arg9[%c0_32, %c0_33], %56 {strides = array<i32>} : memref<8x1xf32, #tpu.memory_space<vmem>>, vector<8x1xf32>,
    %c0_34 = arith.constant 0 : index
    %c0_35 = arith.constant 0 : index
    %58 = vector.load %arg8[%c0_34, %c0_35] : memref<8x1xf32, #tpu.memory_space<vmem>>, vector<8x1xf32>
    tpu.vector_store %arg8[%c0_34, %c0_35], %40 {strides = array<i32>} : memref<8x1xf32, #tpu.memory_space<vmem>>, vector<8x1xf32>,
    %c0_i32_36 = arith.constant 0 : i32
    %59 = arith.cmpi eq, %arg1, %c0_i32_36 : i32
    %60 = arith.extui %59 : i1 to i32
    %cst_37 = arith.constant 0.333333343 : f32
    %c0_i32_38 = arith.constant 0 : i32
    %61 = arith.cmpi ne, %60, %c0_i32_38 : i32
    scf.if %61 {
      %c0_39 = arith.constant 0 : index
      %c0_40 = arith.constant 0 : index
      %62 = vector.load %arg6[%c0_39, %c0_40] : memref<8x1xf32, #tpu.memory_space<vmem>>, vector<8x1xf32>
      %c0_41 = arith.constant 0 : index
      %c0_42 = arith.constant 0 : index
      %63 = vector.load %arg9[%c0_41, %c0_42] : memref<8x1xf32, #tpu.memory_space<vmem>>, vector<8x1xf32>
      %c0_43 = arith.constant 0 : index
      %c0_44 = arith.constant 0 : index
      %64 = vector.load %arg7[%c0_43, %c0_44] : memref<8x1xf32, #tpu.memory_space<vmem>>, vector<8x1xf32>
      %65 = arith.divf %64, %62 : vector<8x1xf32>
      %c0_45 = arith.constant 0 : index
      %c0_46 = arith.constant 0 : index
      %66 = vector.load %arg5[%c0_45, %c0_46] : memref<8x1xf32, #tpu.memory_space<vmem>>, vector<8x1xf32>
      %c0_47 = arith.constant 0 : index
      %c0_48 = arith.constant 0 : index
      %67 = vector.load %arg8[%c0_47, %c0_48] : memref<8x1xf32, #tpu.memory_space<vmem>>, vector<8x1xf32>
      %68 = arith.subf %66, %67 : vector<8x1xf32>
      %69 = vector.broadcast %cst_37 : f32 to vector<8x1xf32>
      %70 = arith.mulf %68, %69 : vector<8x1xf32>
      %71 = arith.subf %65, %70 : vector<8x1xf32>
      %72 = math.log %62 : vector<8x1xf32>
      %73 = arith.subf %71, %72 : vector<8x1xf32>
      %74 = math.log %63 : vector<8x1xf32>
      %75 = arith.addf %73, %74 : vector<8x1xf32>
      %76 = vector.shape_cast %75 : vector<8x1xf32> to vector<1x8x1xf32>
      %cst_49 = arith.constant dense<0.000000e+00> : vector<1xf32>
      %77 = vector.multi_reduction <add>, %76, %cst_49 [1, 2] : vector<1x8x1xf32> to vector<1xf32>
      %78 = vector.shape_cast %77 : vector<1xf32> to vector<1x1x1xf32>
      %79 = vector.extract %78[0, 0, 0] : f32 from vector<1x1x1xf32>
      %80 = tpu.iota {dimensions = array<i32: 1>} : vector<1x8x128xi32>
      %81 = tpu.iota {dimensions = array<i32: 2>} : vector<1x8x128xi32>
      %c0_i32_50 = arith.constant 0 : i32
      %82 = vector.broadcast %c0_i32_50 : i32 to vector<1x8x128xi32>
      %83 = arith.cmpi eq, %80, %82 : vector<1x8x128xi32>
      %c0_i32_51 = arith.constant 0 : i32
      %84 = vector.broadcast %c0_i32_51 : i32 to vector<1x8x128xi32>
      %85 = arith.cmpi eq, %81, %84 : vector<1x8x128xi32>
      %86 = arith.andi %83, %85 : vector<1x8x128xi1>
      %cst_52 = arith.constant 0.000000e+00 : f32
      %87 = vector.broadcast %79 : f32 to vector<1x8x128xf32>
      %88 = vector.broadcast %cst_52 : f32 to vector<1x8x128xf32>
      %89 = arith.select %86, %87, %88 : vector<1x8x128xi1>, vector<1x8x128xf32>
      %c0_53 = arith.constant 0 : index
      %c0_54 = arith.constant 0 : index
      %c0_55 = arith.constant 0 : index
      %90 = vector.load %arg4[%c0_53, %c0_54, %c0_55] : memref<1x8x128xf32, #tpu.memory_space<vmem>>, vector<1x8x128xf32>
      tpu.vector_store %arg4[%c0_53, %c0_54, %c0_55], %89 {strides = array<i32>} : memref<1x8x128xf32, #tpu.memory_space<vmem>>, vector<1x8x128xf32>,
    } else {
    }
    return
  }
  func.func @transform_0(%arg0: i32, %arg1: i32) -> (i32, i32) {
    %c0_i32 = arith.constant 0 : i32
    return %arg0, %arg1 : i32, i32
  }
  func.func @transform_1(%arg0: i32, %arg1: i32) -> (i32, i32) {
    %c0_i32 = arith.constant 0 : i32
    return %arg0, %arg1 : i32, i32
  }
  func.func @transform_2(%arg0: i32, %arg1: i32) -> (i32, i32, i32) {
    %c0_i32 = arith.constant 0 : i32
    %c0_i32_0 = arith.constant 0 : i32
    %c0_i32_1 = arith.constant 0 : i32
    return %arg0, %c0_i32, %c0_i32_0 : i32, i32, i32
  }
}

</mosaic_0001>

<bundles_post_ra>
// kernel: tpu_custom_call.1
= control target key start
LH: loop header
LB: loop body
LE: loop exit
PB: predicated region body
PF: predicated region fallthrough
CT: control target
= control target key end

     0   :  { %7 = vsyncpa [#allocation8], 0  ;;  %s336_s0 = inlined_call_operand.hbm [shape: f32[8,32], index: 0, kind: input, shape index: {}]   ;;  %s337_s1 = inlined_call_operand.hbm [shape: f32[8,32], index: 1, kind: input, shape index: {}]   ;;  %s338_s2 = inlined_call_operand.hbm [shape: f32[1,8,128], index: 2, kind: output, shape index: {}]  }
   0x1   :  { %8 = vsyncpa [#allocation11], 0 }
   0x2   :  { %9 = vsyncpa [#allocation9], 0  ;;  %s15_s11 = sshll.u32 %s336_s0, 4  ;;  %s290_s12 = smov [#allocation7]   ;;  %s16_s11 = int_to_ptr.hbm [resolvable:$true] %s15_s11 }
   0x3   :  { %s17_s13 = sshll.u32 %s290_s12, 4  ;;  %s26_s16 = sshll.u32 %s337_s1, 4  ;;  %s18_s13 = int_to_ptr.vmem [resolvable:$true] %s17_s13  ;;  %s27_s16 = int_to_ptr.hbm [resolvable:$true] %s26_s16 }
   0x4   :  { %20 = dma.hbm_to_vmem [thread:$0]  %s16_s11, 128, %s18_s13, [#allocation8]  }
   0x5   :  { %s291_s17 = smov [#allocation10]  }
   0x6   :  { %s28_s18 = sshll.u32 %s291_s17, 4  ;;  %s29_s18 = int_to_ptr.vmem [resolvable:$true] %s28_s18 }
   0x7   :  { %31 = dma.hbm_to_vmem [thread:$0]  %s27_s16, 128, %s29_s18, [#allocation11]  }
   0x8   :  { %284 = dma.done.wait [#allocation8], 128  }
   0x9   :  { %285 = vsyncadd [#allocation8], 4294967168 }
   0xa   :  { %286 = dma.done.wait [#allocation11], 128  }
   0xb   :  { %287 = vsyncadd [#allocation11], 4294967168  ;;  %vm44_vm0 = vcmask 7168   ;;  %v292_v0 = vmov -3e+38   ;;  %vm53_vm1 = vcmask 261120  }
   0xc   :  { %45 = vst.msk [vmem:[#allocation2] sm:$0xff] %vm44_vm0, %v292_v0  ;;  %v50_v1 = vld [vmem:[#allocation7] sm:$0xff]  ;;  %v51_v3 = vld [vmem:[#allocation10] sm:$0xff]  ;;  %v293_v5 = vmov 0   ;;  %v294_v6 = vmov 0.0   ;;  %s295_s0 = smov [#allocation12]  }
   0xd   :  { %46 = vst.msk [vmem:[#allocation5] sm:$0xff] %vm44_vm0, %v292_v0  ;;  %v54_v2 = vsel %vm53_vm1, %v50_v1, -inf  ;;  %v92_v4 = vsel %vm53_vm1, %v51_v3, -inf  ;;  %196 = vset.pattern.permute.xlu1 %v293_v5  ;;  %197 = vset.pattern.permute.xlu0 %v293_v5  ;;  %v72_v19 = vsub.f32 %v50_v1, %v51_v3  ;;  %s175_s1 = sshll.u32 %s295_s0, 4  ;;  %s177_s21 = sshll.u32 %s338_s2, 4  ;;  %s176_s1 = int_to_ptr.vmem [resolvable:$true] %s175_s1  ;;  %s178_s21 = int_to_ptr.hbm [resolvable:$true] %s177_s21 }
   0xe   :  { %55 = vmax.xlane.f32.xlu0 %v54_v2  ;;  %47 = vst.msk [vmem:[#allocation3] sm:$0xff] %vm44_vm0, %v294_v6 }
   0xf   :  { %48 = vst.msk [vmem:[#allocation6] sm:$0xff] %vm44_vm0, %v294_v6  ;;  %v73_v22 = vmul.f32 0.33333334, %v72_v19 }
  0x10   :  { %49 = vst.msk [vmem:[#allocation4] sm:$0xff] %vm44_vm0, %v294_v6 }
  0x13   :  { %v52_v7 = vld [vmem:[#allocation2] sm:$0xff] }
  0x14   :  { %v91_v11 = vld [vmem:[#allocation5] sm:$0xff] }
  0x15   :  { %v75_v38 = vld [vmem:[#allocation3] sm:$0xff] }
  0x16   :  { %93 = vmax.xlane.f32.xlu0 %v92_v4  ;;  %v110_v47 = vld [vmem:[#allocation6] sm:$0xff] }
  0x17   :  { %v83_v39 = vld [vmem:[#allocation4] sm:$0xff] }
  0x81   :  { %v56_v8 = vpop.xlane.xlu0 %55 }
  0x82   :  { %v57_v9 = vmax.f32 %v52_v7, %v56_v8 }
  0x84   :  { %v58_v10 = vsub.f32 %v52_v7, %v57_v9  ;;  %90 = vst.msk [vmem:[#allocation2] sm:$0xff] %vm44_vm0, %v57_v9  ;;  %65 = vperm.xlu1 %196, %v57_v9  }
  0x86   :  { %v59_v31 = vmul.f32 0.33333334, %v58_v10 }
  0x88   :  { %v60_v32 = vmax.f32 %v59_v31, -100.0 }
  0x89   :  { %v94_v12 = vpop.xlane.xlu0 %93 }
  0x8a   :  { %v95_v13 = vmax.f32 %v91_v11, %v94_v12  ;;  %v61_v33 = vmul.f32 1.442695, %v60_v32 }
  0x8b   :  { %v139_v60 = vld [vmem:[#allocation2] sm:$0xff] }
  0x8c   :  { %v96_v14 = vsub.f32 %v91_v11, %v95_v13  ;;  %117 = vst.msk [vmem:[#allocation5] sm:$0xff] %vm44_vm0, %v95_v13  ;;  %103 = vperm.xlu1 %196, %v95_v13  }
  0x8e   :  { %v97_v34 = vmul.f32 0.33333334, %v96_v14 }
  0x90   :  { %v98_v35 = vmax.f32 %v97_v34, -100.0 }
  0x92   :  { %v99_v36 = vmul.f32 1.442695, %v98_v35 }
  0x93   :  { %v140_v57 = vld [vmem:[#allocation5] sm:$0xff] }
  0x94   :  { %v141_v62 = vsub.f32 %v139_v60, %v140_v57 }
  0x96   :  { %v142_v5 = vmul.f32 0.33333334, %v141_v62 }
  0xf6   :  { %v66_v15 = vpop.permute.xlu1 %65 }
  0xf7   :  { %v68_v16 = vsub.f32 %v50_v1, %v66_v15 }
  0xf9   :  { %v69_v17 = vmul.f32 0.33333334, %v68_v16 }
  0xfb   :  { %v70_v18 = vmul.f32 1.442695, %v69_v17 }
  0xfd   :  { %198 = vpow2.f32 %v70_v18 }
  0xfe   :  { %v104_v20 = vpop.permute.xlu1 %103 }
  0xff   :  { %v106_v21 = vsub.f32 %v51_v3, %v104_v20  ;;  %v160_v20 = vlaneseq }
 0x101   :  { %v107_v23 = vmul.f32 0.33333334, %v106_v21  ;;  %v161_v21 = vshrl.u32 %v160_v20, 7 }
 0x103   :  { %v199_v24 = vpop.eup %198  ;;  %v108_v25 = vmul.f32 1.442695, %v107_v23  ;;  %vm164_vm6 = vcmp.eq.s32.totalorder %v161_v21, 0 }
 0x104   :  { %v77_v26 = vsel %vm53_vm1, %v199_v24, 0.0  ;;  %v74_v27 = vmul.f32 %v199_v24, %v73_v22  ;;  %v163_v22 = vand.u32 127, %v160_v20 }
 0x105   :  { %200 = vpow2.f32 %v108_v25  ;;  %78 = vadd.xlane.f32.xlu2 %v77_v26 }
 0x106   :  { %v85_v28 = vsel %vm53_vm1, %v74_v27, 0.0  ;;  %202 = vpow2.f32 %v61_v33  ;;  %vm165_vm7 = vcmp.eq.s32.totalorder %v163_v22, 0 }
 0x107   :  { %86 = vadd.xlane.f32.xlu0 %v85_v28  ;;  %204 = vpow2.f32 %v99_v36  ;;  %vm166_vm8 = vmand %vm164_vm6, %vm165_vm7 }
 0x10b   :  { %v201_v29 = vpop.eup %200 }
 0x10c   :  { %v112_v30 = vsel %vm53_vm1, %v201_v29, 0.0  ;;  %v203_v37 = vpop.eup %202 }
 0x10d   :  { %113 = vadd.xlane.f32.xlu2 %v112_v30  ;;  %v76_v40 = vmul.f32 %v203_v37, %v75_v38  ;;  %v84_v43 = vmul.f32 %v203_v37, %v83_v39  ;;  %v205_v46 = vpop.eup %204 }
 0x10e   :  { %v111_v48 = vmul.f32 %v205_v46, %v110_v47 }
 0x178   :  { %v79_v41 = vpop.xlane.xlu2 %78 }
 0x179   :  { %v80_v42 = vadd.f32 %v79_v41, %v76_v40 }
 0x17a   :  { %v87_v44 = vpop.xlane.xlu0 %86 }
 0x17b   :  { %82 = vst.msk [vmem:[#allocation3] sm:$0xff] %vm44_vm0, %v80_v42  ;;  %v88_v45 = vadd.f32 %v87_v44, %v84_v43 }
 0x17d   :  { %89 = vst.msk [vmem:[#allocation4] sm:$0xff] %vm44_vm0, %v88_v45 }
 0x180   :  { %v114_v49 = vpop.xlane.xlu2 %113 }
 0x181   :  { %v115_v50 = vadd.f32 %v114_v49, %v111_v48 }
 0x182   :  { %v121_v51 = vld [vmem:[#allocation3] sm:$0xff] }
 0x183   :  { %116 = vst.msk [vmem:[#allocation6] sm:$0xff] %vm44_vm0, %v115_v50  ;;  %206 = vrcp.f32 %v121_v51  ;;  %v135_v56 = vand.u32 2147483648, %v121_v51  ;;  %v133_v59 = vand.u32 2147483647, %v121_v51  ;;  %vm129_vm3 = vweird.f32 %v121_v51 }
 0x184   :  { %208 = vlog2.f32 %v121_v51  ;;  %v123_v2 = vld [vmem:[#allocation4] sm:$0xff] }
 0x185   :  { %v136_v63 = vor.u32 1.1754944e-38, %v135_v56  ;;  %vm134_vm5 = vcmp.eq.f32.partialorder %v133_v59, 8.507059e+37 }
 0x189   :  { %v207_v52 = vpop.eup %206 }
 0x18a   :  { %v125_v53 = vmul.f32 %v207_v52, %v121_v51  ;;  %v122_v54 = vld [vmem:[#allocation6] sm:$0xff]  ;;  %vm130_vm2 = vweird.f32 %v207_v52  ;;  %v209_v1 = vpop.eup %208 }
 0x18b   :  { %210 = vlog2.f32 %v122_v54  ;;  %vm131_vm4 = vmor %vm129_vm3, %vm130_vm2  ;;  %v145_v8 = vmul.f32 0.6931472, %v209_v1 }
 0x18c   :  { %v126_v55 = vsub.f32 1.0, %v125_v53 }
 0x18e   :  { %v127_v58 = vmul.f32 %v207_v52, %v126_v55 }
 0x190   :  { %v128_v61 = vadd.f32 %v207_v52, %v127_v58 }
 0x191   :  { %v211_v6 = vpop.eup %210 }
 0x192   :  { %v132_v0 = vsel %vm131_vm4, %v207_v52, %v128_v61  ;;  %v148_v10 = vmul.f32 0.6931472, %v211_v6 }
 0x193   :  { %v137_v3 = vsel %vm134_vm5, %v136_v63, %v132_v0 }
 0x194   :  { %v138_v4 = vmul.f32 %v137_v3, %v123_v2 }
 0x196   :  { %v143_v7 = vsub.f32 %v138_v4, %v142_v5 }
 0x198   :  { %v146_v9 = vsub.f32 %v143_v7, %v145_v8 }
 0x19a   :  { %v149_v11 = vadd.f32 %v148_v10, %v146_v9 }
 0x19c   :  { %v150_v12 = vsel %vm44_vm0, %v149_v11, 0.0 }
 0x19d   :  { %151 = vadd.xlane.f32.xlu1 %v150_v12 }
 0x210   :  { %v152_v13 = vpop.xlane.xlu1 %151 }
 0x211   :  { %v153_v14 = vrot.slane %v152_v13, 4 }
 0x213   :  { %v154_v15 = vadd.f32 %v153_v14, %v152_v13 }
 0x215   :  { %v155_v16 = vrot.slane %v154_v15, 2 }
 0x217   :  { %v156_v17 = vadd.f32 %v155_v16, %v154_v15 }
 0x219   :  { %v157_v18 = vrot.slane %v156_v17, 1 }
 0x21b   :  { %v158_v19 = vadd.f32 %v157_v18, %v156_v17 }
 0x21d   :  { %188 = vpush %v158_v19 }
 0x24e   :  { %s189_s22 = spop %188 }
 0x24f   :  { %v167_v23 = vstv %s189_s22 }
 0x250   :  { %v168_v24 = vsel %vm166_vm8, %v167_v23, 0.0 }
 0x251   :  { %169 = vst [vmem:[#allocation12] sm:$0xff] %v168_v24 }
 0x252   :  { %180 = dma.vmem_to_hbm [thread:$0]  %s176_s1, 128, %s178_s21, [#allocation9]  }
 0x253   :  { %288 = dma.done.wait [#allocation9], 128  }
 0x254   :  { %289 = vsyncadd [#allocation9], 4294967168 }
 0x255   :  { %185 = vsyncpa [#allocation8], 1 }
 0x256   :  { %186 = vsyncpa [#allocation11], 1 }
 0x257   :  { %187 = vsyncpa [#allocation9], 1 }

</bundles_post_ra>
